<compile_context>
chip_gen: v6e
topology: v6e:2x2x1
jax: 0.10.0
libtpu: 0.0.40
codegen_flags: <defaults>
</compile_context>

<pallas_src>
import jax
import jax.numpy as jnp
from jax import lax
from jax.experimental import pallas as pl
from jax.experimental.pallas import tpu as pltpu


# ---------------------------------------------------------------------------
# Kernel body
# ---------------------------------------------------------------------------
def _mlp_mse_kernel(coords_ref, rgb_ref, w1_ref, w2_ref, pred_ref, sse_ref):
    # coords_ref: (D_in+1, tile_n)  features on sublanes, pixels on lanes
    # rgb_ref   : (3, tile_n)       f32 ground truth (kept exact for the MSE target)
    # w1_ref    : (H+1, D_in+1)     last row is a one-hot forwarding the
    #                               constant-1 coordinate feature (bias fold)
    # w2_ref    : (3, H+1)          last column carries b2
    # pred_ref  : (3, tile_n)       predicted RGB (bf16 by default)
    # sse_ref   : (1, 1, 128)       per-tile SSE partial, broadcast across lanes
    x = coords_ref[...]
    h = jnp.dot(w1_ref[...], x, preferred_element_type=jnp.float32)       # (H+1, tile_n)
    h = jnp.maximum(h, 0.0)                # ReLU; the constant-1 row stays 1
    h = h.astype(w2_ref.dtype)             # bf16 for the 2nd MXU pass (no-op in f32 mode)
    logits = jnp.dot(w2_ref[...], h, preferred_element_type=jnp.float32)  # (3, tile_n)

    # sigmoid(x) == 0.5*(tanh(0.5*x)+1): single EUP push per element.
    pred = 0.5 * (jnp.tanh(0.5 * logits) + 1.0)

    pred_ref[...] = pred.astype(pred_ref.dtype)

    # SSE in f32 from the pre-cast pred, so loss numerics don't see the bf16 store.
    diff = pred - rgb_ref[...].astype(jnp.float32)
    tile_sse = jnp.sum(diff * diff)                                        # scalar
    sse_ref[...] = jnp.broadcast_to(tile_sse, sse_ref.shape)


# ---------------------------------------------------------------------------
# Tiling / VMEM heuristics
# ---------------------------------------------------------------------------
def _tpu_is_v7():
    try:
        kind = jax.devices()[0].device_kind.lower()
    except Exception:
        return False
    return ("v7" in kind) or ("tpu7" in kind)


def _pick_tile(n, *, is_v7, max_tile=None, min_tiles=None):
    """Largest lane-aligned tile (multiple of 128), generation aware."""
    if max_tile is None:
        max_tile = 32768 if is_v7 else 65536     # v7x: 64 MiB VMEM cap
    if min_tiles is None:
        min_tiles = 4 if is_v7 else 1            # keep both v7x TensorCores busy
    n128 = -(-n // 128) * 128
    tile = min(n128, max_tile)
    if min_tiles > 1:
        target = -(-n128 // min_tiles)
        target = max(128, -(-target // 128) * 128)
        tile = min(tile, target)
    return tile


def _vmem_limit_bytes(tile_n, d_in_p, hidden_p, in_bytes, pred_bytes, *, is_v7):
    # double-buffered streamed blocks (coords, gt rgb, pred, sse)
    blocks = 2 * tile_n * (d_in_p * in_bytes + 3 * 4 + 3 * pred_bytes) + 2 * 128 * 4
    # in-kernel intermediates: h (f32, plus a cast copy) + logits/pred/diff slabs
    inter = tile_n * (hidden_p * 4 * 2 + 3 * 4 * 4)
    weights = hidden_p * (d_in_p + 3) * in_bytes
    need = blocks + inter + weights
    cap = (48 << 20) if is_v7 else (96 << 20)
    return int(min(cap, max(32 << 20, 2 * need)))


# ---------------------------------------------------------------------------
# One-time layout plumbing (hoist OUT of the training hot path)
# ---------------------------------------------------------------------------
def prepare_image_fit_batch(batch, *, tile_n=None, coords_dtype=jnp.bfloat16):
    """Build the lane-dense transposed layout once (coords/gt are static in img-fit)."""
    coords = jnp.asarray(batch["coords"], jnp.float32)      # (N, D_in)
    gt_rgb = jnp.asarray(batch["rgb"], jnp.float32)         # (N, 3)
    n, d_in = coords.shape

    is_v7 = _tpu_is_v7()
    if tile_n is None:
        tile_n = _pick_tile(n, is_v7=is_v7)
    assert tile_n % 128 == 0
    n_pad = -(-n // tile_n) * tile_n

    # (D_in+1, N): constant-1 feature row carries the folded bias.
    coords_aug = jnp.concatenate([coords.T, jnp.ones((1, n), jnp.float32)], axis=0)
    rgb_t = gt_rgb.T                                                        # (3, N)
    if n_pad > n:
        # Padded pixels: all-zero coords -> logits 0 -> pred 0.5 exactly; pairing
        # them with gt 0.5 makes their SSE contribution exactly zero.
        coords_aug = jnp.pad(coords_aug, ((0, 0), (0, n_pad - n)))
        rgb_t = jnp.pad(rgb_t, ((0, 0), (0, n_pad - n)), constant_values=0.5)

    return {
        "coords_aug": coords_aug.astype(coords_dtype),   # (D_in+1, N_pad), bf16 stream
        "rgb_t": rgb_t,                                  # (3, N_pad), f32 (exact MSE target)
        "n": n, "d_in": d_in, "tile_n": tile_n, "n_pad": n_pad, "is_v7": is_v7,
    }


def _fold_params(params, d_in, mm_dtype):
    """Fold biases into the weights (tiny; done per step since params train)."""
    w1 = jnp.asarray(params["w1"], jnp.float32)                 # (D_in, H)
    b1 = jnp.asarray(params["b1"], jnp.float32).reshape(-1)     # (H,)
    w2 = jnp.asarray(params["w2"], jnp.float32)                 # (H, 3)
    b2 = jnp.asarray(params["b2"], jnp.float32).reshape(-1)     # (3,)
    hidden = w1.shape[1]
    one_hot = jnp.zeros((1, d_in + 1), jnp.float32).at[0, d_in].set(1.0)
    w1_aug = jnp.concatenate(
        [jnp.concatenate([w1.T, b1[:, None]], axis=1), one_hot], axis=0)   # (H+1, D_in+1)
    w2_aug = jnp.concatenate([w2.T, b2[:, None]], axis=1)                  # (3, H+1)
    return w1_aug.astype(mm_dtype), w2_aug.astype(mm_dtype)


# ---------------------------------------------------------------------------
# Forward (pre-laid-out inputs) — the training-step hot path
# ---------------------------------------------------------------------------
def network_wrapper_forward_prepared(prepared, params, *,
                                     mm_dtype=jnp.bfloat16,
                                     pred_dtype=jnp.bfloat16,
                                     transpose_output=True):
    coords_aug = prepared["coords_aug"]
    rgb_t = prepared["rgb_t"]
    n, d_in = prepared["n"], prepared["d_in"]
    tile_n, n_pad, is_v7 = prepared["tile_n"], prepared["n_pad"], prepared["is_v7"]
    num_tiles = n_pad // tile_n

    w1_aug, w2_aug = _fold_params(params, d_in, mm_dtype)
    d_in_p = d_in + 1
    hidden_p = w1_aug.shape[0]

    in_bytes = jnp.dtype(coords_aug.dtype).itemsize
    pred_bytes = jnp.dtype(pred_dtype).itemsize
    vmem_limit = _vmem_limit_bytes(tile_n, d_in_p, hidden_p, in_bytes, pred_bytes,
                                   is_v7=is_v7)

    cost = pl.CostEstimate(
        flops=2 * n_pad * (hidden_p * d_in_p + 3 * hidden_p),
        transcendentals=3 * n_pad,
        bytes_accessed=(d_in_p * n_pad * in_bytes          # coords stream
                        + 3 * n_pad * 4                    # gt rgb stream
                        + 3 * n_pad * pred_bytes           # pred writeback
                        + num_tiles * 128 * 4),            # SSE partials
    )

    pred_t, sse_partials = pl.pallas_call(
        _mlp_mse_kernel,
        out_shape=(
            jax.ShapeDtypeStruct((3, n_pad), pred_dtype),
            jax.ShapeDtypeStruct((num_tiles, 1, 128), jnp.float32),
        ),
        grid=(num_tiles,),
        in_specs=[
            pl.BlockSpec((d_in_p, tile_n), lambda i: (0, i)),      # coords tile
            pl.BlockSpec((3, tile_n), lambda i: (0, i)),           # gt rgb tile
            pl.BlockSpec((hidden_p, d_in_p), lambda i: (0, 0)),    # w1 (resident)
            pl.BlockSpec((3, hidden_p), lambda i: (0, 0)),         # w2 (resident)
        ],
        out_specs=(
            pl.BlockSpec((3, tile_n), lambda i: (0, i)),           # predicted rgb
            pl.BlockSpec((1, 1, 128), lambda i: (i, 0, 0)),        # per-tile SSE
        ),
        compiler_params=pltpu.CompilerParams(
            dimension_semantics=("parallel",),                     # independent tiles
            vmem_limit_bytes=vmem_limit,
        ),
        cost_estimate=cost,
    )(coords_aug, rgb_t, w1_aug, w2_aug)

    # Each lane of a partial holds the same tile SSE -> dense sum / 128 (exact, pow2).
    sse = jnp.sum(sse_partials) * jnp.float32(1.0 / 128.0)
    # nn.MSELoss(reduction='mean') over the *true* (unpadded) element count.
    color_loss = sse / jnp.float32(n * 3)

    loss = color_loss
    psnr = -10.0 * jnp.log(lax.stop_gradient(color_loss)) / jnp.log(jnp.float32(10.0))

    pred_t = pred_t[:, :n]
    # Only materialize the (N, 3) layout if the consumer actually needs it
    # (the transpose is another full pass over pred).
    rgb_out = pred_t.T if transpose_output else pred_t

    output = {"rgb": rgb_out}
    scalar_stats = {"color_mse": color_loss, "psnr": psnr, "loss": loss}
    image_stats = {}
    return output, loss, scalar_stats, image_stats


def network_wrapper_forward(batch, params, **kwargs):
    """Convenience wrapper matching NetworkWrapper.forward(batch).

    In a real training loop, call prepare_image_fit_batch(batch) ONCE and reuse
    the prepared layout every step; this wrapper re-does the layout plumbing.
    """
    prepared = prepare_image_fit_batch(batch)
    return network_wrapper_forward_prepared(prepared, params, **kwargs)


# ---------------------------------------------------------------------------
# Parameter init + pure-JAX reference
# ---------------------------------------------------------------------------
def init_params(key, d_in, hidden, d_out=3):
    k1, k2 = jax.random.split(key)
    w1 = jax.random.normal(k1, (d_in, hidden), jnp.float32) * (1.0 / jnp.sqrt(d_in))
    b1 = jnp.zeros((1, hidden), jnp.float32)
    w2 = jax.random.normal(k2, (hidden, d_out), jnp.float32) * (1.0 / jnp.sqrt(hidden))
    b2 = jnp.zeros((1, d_out), jnp.float32)
    return {"w1": w1, "b1": b1, "w2": w2, "b2": b2}


def _reference_forward(coords, rgb, params):
    """Pure-JAX f32 reference for a numerical sanity check."""
    h = jnp.maximum(coords @ params["w1"] + params["b1"], 0.0)
    pred = jax.nn.sigmoid(h @ params["w2"] + params["b2"])
    mse = jnp.mean((pred - rgb) ** 2)
    return pred, mse


if __name__ == "__main__":
    key = jax.random.PRNGKey(0)
    k_coords, k_rgb, k_params = jax.random.split(key, 3)

    # Image-fitting batch: 16x16 image -> 256 pixels, 4 input features
    # (normalized x, y plus 2 extra positional features), ground-truth RGB.
    H_IMG = W_IMG = 16
    N = H_IMG * W_IMG
    D_IN = 4
    HIDDEN = 32

    ys, xs = jnp.meshgrid(
        jnp.linspace(-1.0, 1.0, H_IMG), jnp.linspace(-1.0, 1.0, W_IMG), indexing="ij"
    )
    base = jnp.stack([xs.reshape(-1), ys.reshape(-1)], axis=-1)            # (N, 2)
    extra = jax.random.normal(k_coords, (N, D_IN - 2), jnp.float32) * 0.1
    coords = jnp.concatenate([base, extra], axis=-1).astype(jnp.float32)   # (N, 4)
    gt_rgb = jax.random.uniform(k_rgb, (N, 3), jnp.float32)                # (N, 3)

    params = init_params(k_params, D_IN, HIDDEN)

    # --- layout plumbing hoisted once; forward is the hot path ---
    prepared = prepare_image_fit_batch({"coords": coords, "rgb": gt_rgb})
    output, loss, scalar_stats, image_stats = network_wrapper_forward_prepared(
        prepared, params)
    jax.block_until_ready(loss)
    jax.block_until_ready(output["rgb"])

    # Sanity check vs. pure-JAX f32 reference (bf16 streaming inputs + bf16 pred
    # store -> tolerances loosened accordingly; loss itself is f32 in-kernel).
    ref_pred, ref_mse = _reference_forward(coords, gt_rgb, params)
    assert output["rgb"].shape == (N, 3)
    assert jnp.allclose(output["rgb"].astype(jnp.float32), ref_pred, rtol=0.0, atol=1.5e-2)
    assert jnp.allclose(loss, ref_mse, rtol=5e-2, atol=1e-3)
    ref_psnr = -10.0 * jnp.log(ref_mse) / jnp.log(jnp.float32(10.0))
    assert jnp.allclose(scalar_stats["psnr"], ref_psnr, rtol=5e-2, atol=0.1)

    # Padded-tile path: N not a multiple of 128 (review correctness concern).
    N2 = 200
    batch2 = {"coords": coords[:N2], "rgb": gt_rgb[:N2]}
    out2, loss2, stats2, _ = network_wrapper_forward(batch2, params)
    jax.block_until_ready(loss2)
    ref_pred2, ref_mse2 = _reference_forward(coords[:N2], gt_rgb[:N2], params)
    assert out2["rgb"].shape == (N2, 3)
    assert jnp.allclose(out2["rgb"].astype(jnp.float32), ref_pred2, rtol=0.0, atol=1.5e-2)
    assert jnp.allclose(loss2, ref_mse2, rtol=5e-2, atol=1e-3)

    print("KERNEL_OK")
</pallas_src>

<mosaic_0001>
module attributes {stable_mosaic.version = 11 : i64} {
  func.func @_mlp_mse_kernel(%arg0: i32, %arg1: memref<5x256xbf16, #tpu.memory_space<vmem>>, %arg2: memref<3x256xf32, #tpu.memory_space<vmem>>, %arg3: memref<33x5xbf16, #tpu.memory_space<vmem>>, %arg4: memref<3x33xbf16, #tpu.memory_space<vmem>>, %arg5: memref<3x256xbf16, #tpu.memory_space<vmem>>, %arg6: memref<1x1x128xf32, #tpu.memory_space<vmem>>) attributes {dimension_semantics = [#tpu.dimension_semantics<parallel>], iteration_bounds = array<i64: 1>, scalar_prefetch = 0 : i64, scratch_operands = 0 : i64, tpu.core_type = #tpu.core_type<tc>, window_params = [{transform_indices = @transform_0, window_bounds = array<i64: 5, 256>}, {transform_indices = @transform_1, window_bounds = array<i64: 3, 256>}, {pipeline_mode = #tpu.pipeline_mode<synchronous>, transform_indices = @transform_2, window_bounds = array<i64: 33, 5>}, {pipeline_mode = #tpu.pipeline_mode<synchronous>, transform_indices = @transform_3, window_bounds = array<i64: 3, 33>}, {transform_indices = @transform_4, window_bounds = array<i64: 3, 256>}, {transform_indices = @transform_5, window_bounds = array<i64: 1, 1, 128>}]} {
    %c0 = arith.constant 0 : index
    %c0_0 = arith.constant 0 : index
    %0 = vector.load %arg1[%c0, %c0_0] : memref<5x256xbf16, #tpu.memory_space<vmem>>, vector<5x256xbf16>
    %c0_1 = arith.constant 0 : index
    %c0_2 = arith.constant 0 : index
    %1 = vector.load %arg3[%c0_1, %c0_2] : memref<33x5xbf16, #tpu.memory_space<vmem>>, vector<33x5xbf16>
    %cst = arith.constant dense<0.000000e+00> : vector<33x256xf32>
    %2 = tpu.matmul %1, %0, %cst {dimension_numbers = #tpu.dot_dimension_numbers<[1], [0], [0], [1], [0, 0, 1, 1], [], []>} : vector<33x5xbf16>, vector<5x256xbf16>, vector<33x256xf32> -> vector<33x256xf32>
    %cst_3 = arith.constant 0.000000e+00 : f32
    %3 = vector.broadcast %cst_3 : f32 to vector<33x256xf32>
    %4 = arith.maximumf %2, %3 : vector<33x256xf32>
    %5 = arith.truncf %4 : vector<33x256xf32> to vector<33x256xbf16>
    %c0_4 = arith.constant 0 : index
    %c0_5 = arith.constant 0 : index
    %6 = vector.load %arg4[%c0_4, %c0_5] : memref<3x33xbf16, #tpu.memory_space<vmem>>, vector<3x33xbf16>
    %cst_6 = arith.constant dense<0.000000e+00> : vector<3x256xf32>
    %7 = tpu.matmul %6, %5, %cst_6 {dimension_numbers = #tpu.dot_dimension_numbers<[1], [0], [0], [1], [0, 0, 1, 1], [], []>} : vector<3x33xbf16>, vector<33x256xbf16>, vector<3x256xf32> -> vector<3x256xf32>
    %cst_7 = arith.constant 5.000000e-01 : f32
    %8 = vector.broadcast %cst_7 : f32 to vector<3x256xf32>
    %9 = arith.mulf %8, %7 : vector<3x256xf32>
    %10 = math.tanh %9 : vector<3x256xf32>
    %cst_8 = arith.constant 1.000000e+00 : f32
    %11 = vector.broadcast %cst_8 : f32 to vector<3x256xf32>
    %12 = arith.addf %10, %11 : vector<3x256xf32>
    %cst_9 = arith.constant 5.000000e-01 : f32
    %13 = vector.broadcast %cst_9 : f32 to vector<3x256xf32>
    %14 = arith.mulf %13, %12 : vector<3x256xf32>
    %15 = arith.truncf %14 : vector<3x256xf32> to vector<3x256xbf16>
    %c0_10 = arith.constant 0 : index
    %c0_11 = arith.constant 0 : index
    %16 = vector.load %arg5[%c0_10, %c0_11] : memref<3x256xbf16, #tpu.memory_space<vmem>>, vector<3x256xbf16>
    tpu.vector_store %arg5[%c0_10, %c0_11], %15 {strides = array<i32>} : memref<3x256xbf16, #tpu.memory_space<vmem>>, vector<3x256xbf16>,
    %c0_12 = arith.constant 0 : index
    %c0_13 = arith.constant 0 : index
    %17 = vector.load %arg2[%c0_12, %c0_13] : memref<3x256xf32, #tpu.memory_space<vmem>>, vector<3x256xf32>
    %18 = arith.subf %14, %17 : vector<3x256xf32>
    %19 = arith.mulf %18, %18 : vector<3x256xf32>
    %20 = vector.shape_cast %19 : vector<3x256xf32> to vector<1x3x256xf32>
    %cst_14 = arith.constant dense<0.000000e+00> : vector<1xf32>
    %21 = vector.multi_reduction <add>, %20, %cst_14 [1, 2] : vector<1x3x256xf32> to vector<1xf32>
    %22 = vector.shape_cast %21 : vector<1xf32> to vector<1x1x1xf32>
    %23 = vector.extract %22[0, 0, 0] : f32 from vector<1x1x1xf32>
    %24 = vector.broadcast %23 : f32 to vector<1x1x128xf32>
    %c0_15 = arith.constant 0 : index
    %c0_16 = arith.constant 0 : index
    %c0_17 = arith.constant 0 : index
    %25 = vector.load %arg6[%c0_15, %c0_16, %c0_17] : memref<1x1x128xf32, #tpu.memory_space<vmem>>, vector<1x1x128xf32>
    tpu.vector_store %arg6[%c0_15, %c0_16, %c0_17], %24 {strides = array<i32>} : memref<1x1x128xf32, #tpu.memory_space<vmem>>, vector<1x1x128xf32>,
    return
  }
  func.func @transform_0(%arg0: i32) -> (i32, i32) {
    %c0_i32 = arith.constant 0 : i32
    %c0_i32_0 = arith.constant 0 : i32
    return %c0_i32, %arg0 : i32, i32
  }
  func.func @transform_1(%arg0: i32) -> (i32, i32) {
    %c0_i32 = arith.constant 0 : i32
    %c0_i32_0 = arith.constant 0 : i32
    return %c0_i32, %arg0 : i32, i32
  }
  func.func @transform_2(%arg0: i32) -> (i32, i32) {
    %c0_i32 = arith.constant 0 : i32
    %c0_i32_0 = arith.constant 0 : i32
    %c0_i32_1 = arith.constant 0 : i32
    return %c0_i32, %c0_i32_0 : i32, i32
  }
  func.func @transform_3(%arg0: i32) -> (i32, i32) {
    %c0_i32 = arith.constant 0 : i32
    %c0_i32_0 = arith.constant 0 : i32
    %c0_i32_1 = arith.constant 0 : i32
    return %c0_i32, %c0_i32_0 : i32, i32
  }
  func.func @transform_4(%arg0: i32) -> (i32, i32) {
    %c0_i32 = arith.constant 0 : i32
    %c0_i32_0 = arith.constant 0 : i32
    return %c0_i32, %arg0 : i32, i32
  }
  func.func @transform_5(%arg0: i32) -> (i32, i32, i32) {
    %c0_i32 = arith.constant 0 : i32
    %c0_i32_0 = arith.constant 0 : i32
    %c0_i32_1 = arith.constant 0 : i32
    return %arg0, %c0_i32, %c0_i32_0 : i32, i32, i32
  }
}

</mosaic_0001>

<bundles_post_ra>
// kernel: tpu_custom_call.1
= control target key start
LH: loop header
LB: loop body
LE: loop exit
PB: predicated region body
PF: predicated region fallthrough
CT: control target
= control target key end

     0   :  { %11 = vsyncpa [#allocation3], 0  ;;  %vm56_vm0 = vcmask 1041408   ;;  %vm57_vm1 = vcmask 1042432   ;;  %v350_v2 = vmov 65535   ;;  %v351_v5 = vmov 0   ;;  %s414_s0 = inlined_call_operand.vmem [shape: bf16[5,256], index: 0, kind: input, shape index: {}]   ;;  %s415_s1 = inlined_call_operand.vmem [shape: f32[3,256], index: 1, kind: input, shape index: {}]   ;;  %s416_s2 = inlined_call_operand.vmem [shape: bf16[33,5], index: 2, kind: input, shape index: {}]   ;;  %s417_s3 = inlined_call_operand.vmem [shape: bf16[3,33], index: 3, kind: input, shape index: {}]   ;;  %s418_s4 = inlined_call_operand.hbm [shape: bf16[3,256], index: 4, kind: output, shape index: {0}]   ;;  %s419_s5 = inlined_call_operand.hbm [shape: f32[1,1,128], index: 5, kind: output, shape index: {1}]  }
   0x1   :  { %v22_v0 = vld [vmem:[%s414_s0] sm:$0x77]  ;;  %v58_v3 = vsel %vm56_vm0, 4294967295, %v350_v2  ;;  %98 = vmatprep.mubr.bf16.mxu0 %v351_v5  ;;  %189 = vmatprep.mubr.bf16.mxu1 %v351_v5 }
   0x2   :  { %v283_v1 = vcombine.high %v22_v0, %v22_v0  ;;  %v282_v4 = vcombine.low %v22_v0, %v22_v0  ;;  %v59_v6 = vsel %vm57_vm1, %v58_v3, 0 }
   0x4   :  { %v64_v7 = vand.u32 %v283_v1, %v59_v6  ;;  %v61_v8 = vand.u32 %v282_v4, %v59_v6 }
   0x5   :  { %12 = vsyncpa [#allocation5], 0  ;;  %v298_v9 = vld [vmem:[%s416_s2] sm:$0xff]   ;;  %vm46_vm2 = vcmask 39936   ;;  %v299_v10 = vld [vmem:[%s416_s2 + $0x8] sm:$0xff]   ;;  %vm148_vm3 = vcmask 1040384   ;;  %v214_v52 = vlaneseq }
   0x6   :  { %80 = vmatprep.subr.bf16.mxu0 %v64_v7  ;;  %v300_v11 = vld [vmem:[%s416_s2 + $0x10] ss:$0 sps:$4 sm:$0x11]   ;;  %v150_v28 = vsel %vm148_vm3, 65535, %v351_v5  ;;  %v143_v43 = vld [vmem:[%s417_s3] sm:$0x3] }
   0x7   :  { %81 = vmatpush1.bf16.msra.mxu0 %v61_v8  ;;  %vm144_vm4 = vcmask 269312   ;;  %v352_v50 = vmov 1983009808   ;;  %v229_v54 = vld [vmem:[%s415_s1] sm:$0x77]  ;;  %v215_v57 = vshrl.u32 %v214_v52, 7 }
   0x8   :  { %v212_v51 = vunpack.c.l.s4 %v352_v50  ;;  %vm220_vm5 = vsmask.f32 1280  ;;  %vm222_vm6 = vcmask 1043458   ;;  %vm223_vm7 = vsmask.f32 3328  ;;  %s353_s1 = smov [#allocation2]  }
   0x9   :  { %v231_v61 = vcombine.high %v229_v54, %v229_v54  ;;  %vm221_vm8 = vmand %vm56_vm0, %vm220_vm5  ;;  %v226_v4 = vld [vmem:[#allocation2] sm:$0xf]  ;;  %s257_s3 = sshll.u32 %s353_s1, 4  ;;  %s258_s3 = int_to_ptr.vmem [resolvable:$true] %s257_s3 }
   0xa   :  { %284 = vmatmul.mubr.msk.bf16.vlgmr.msra.gmra.mxu0 %vm46_vm2, %v298_v9  ;;  %v213_v56 = vunpack.c.0.s8 %v212_v51  ;;  %vm224_vm9 = vmand %vm222_vm6, %vm223_vm7  ;;  %s306_s28 = scalar_lea.vmem %s258_s3, 64  ;;  %p311_p1 = scmp.lt.s32.totalorder %s258_s3, %s258_s3 }
   0xb   :  { %108 = vmatprep.mubr.bf16.mxu0 %v351_v5  ;;  %vm225_vm10 = vmor %vm224_vm9, %vm221_vm8  ;;  %p307_p0 = scmp.ne.s32.totalorder %s258_s3, %s306_s28  ;;  %p312_p2 = scmp.lt.s32.totalorder %s306_s28, %s306_s28 }
   0xc   :  { %v216_v0 = vsub.s32 %v213_v56, %v215_v57 }
   0xd   :  { %p313_p3 = por %p312_p2, %p311_p1 }
   0xf   :  { %p314_p4 = pnand %p313_p3, %p307_p0 }
  0x12   :  { %285 = vmatmul.mubr.msk.bf16.gmra.mxu0 %vm46_vm2, %v299_v10 }
  0x13   :  { %118 = vmatprep.mubr.bf16.mxu0 %v351_v5 }
  0x1a   :  { %286 = vmatmul.mubr.msk.bf16.gmra.mxu0 %vm46_vm2, %v300_v11 }
  0xca   :  { %v100_v12 = vpop.f32.mrf.mxu0 }
  0xcb   :  { %v127_v41 = vmax.f32 %v100_v12, 0.0 }
  0xcc   :  { %v102_v13 = vpop.f32.mrf.mxu0 }
  0xcd   :  { %v128_v37 = vmax.f32 %v102_v13, 0.0 }
  0xce   :  { %v104_v14 = vpop.f32.mrf.mxu0 }
  0xcf   :  { %v129_v38 = vmax.f32 %v104_v14, 0.0 }
  0xd0   :  { %v106_v15 = vpop.f32.mrf.mxu0 }
  0xd1   :  { %v130_v34 = vmax.f32 %v106_v15, 0.0  ;;  %v137_v42 = vpack.c.bf16 %v129_v38, %v127_v41 }
  0xd2   :  { %v110_v16 = vpop.f32.mrf.mxu0 }
  0xd3   :  { %v131_v36 = vmax.f32 %v110_v16, 0.0  ;;  %v138_v40 = vpack.c.bf16 %v130_v34, %v128_v37 }
  0xd4   :  { %v112_v17 = vpop.f32.mrf.mxu0 }
  0xd5   :  { %v132_v30 = vmax.f32 %v112_v17, 0.0 }
  0xd6   :  { %v114_v18 = vpop.f32.mrf.mxu0 }
  0xd7   :  { %v133_v32 = vmax.f32 %v114_v18, 0.0 }
  0xd8   :  { %v116_v19 = vpop.f32.mrf.mxu0 }
  0xd9   :  { %v134_v26 = vmax.f32 %v116_v19, 0.0  ;;  %v139_v39 = vpack.c.bf16 %v133_v32, %v131_v36 }
  0xda   :  { %v120_v20 = vpop.f32.mrf.mxu0 }
  0xdb   :  { %v135_v21 = vmax.f32 %v120_v20, 0.0  ;;  %v140_v35 = vpack.c.bf16 %v134_v26, %v132_v30 }
  0xdc   :  { %v122_v22 = vpop.f32.mrf.mxu0 }
  0xdd   :  { %v136_v23 = vmax.f32 %v122_v22, 0.0  ;;  %v141_v24 = vpack.c.bf16 %v135_v21, %v135_v21 }
  0xde   :  { %v124_v25 = vpop.f32.mrf.mxu0 }
  0xdf   :  { %v142_v27 = vpack.c.bf16 %v136_v23, %v136_v23  ;;  %v152_v33 = vand.u32 %v150_v28, %v141_v24 }
  0xe0   :  { %v125_v29 = vpop.f32.mrf.mxu0 }
  0xe1   :  { %v155_v31 = vand.u32 %v150_v28, %v142_v27 }
  0xe3   :  { %167 = vmatprep.subr.bf16.mxu1 %v155_v31 }
  0xe4   :  { %168 = vmatpush1.bf16.msra.mxu1 %v152_v33 }
  0xe5   :  { %169 = vmatprep.subr.bf16.mxu1 %v140_v35 }
  0xe8   :  { %170 = vmatpush1.bf16.msra.mxu1 %v139_v39 }
  0xe9   :  { %171 = vmatprep.subr.bf16.mxu1 %v138_v40 }
  0xec   :  { %172 = vmatpush1.bf16.msra.mxu1 %v137_v42 }
  0xef   :  { %287 = vmatmul.mubr.msk.bf16.vlgmr.msra.gmra.mxu1 %vm144_vm4, %v143_v43 }
 0x1af   :  { %v191_v44 = vpop.f32.mrf.mxu1 }
 0x1b0   :  { %v198_v45 = vmul.f32 0.5, %v191_v44 }
 0x1b1   :  { %v193_v46 = vpop.f32.mrf.mxu1 }
 0x1b2   :  { %302 = vtanh.f32 %v198_v45  ;;  %v199_v47 = vmul.f32 0.5, %v193_v46 }
 0x1b3   :  { %v195_v48 = vpop.f32.mrf.mxu1 }
 0x1b4   :  { %304 = vtanh.f32 %v199_v47 }
 0x1b5   :  { %v196_v49 = vpop.f32.mrf.mxu1 }
 0x1bf   :  { %v303_v53 = vpop.eup %302 }
 0x1c0   :  { %v202_v55 = vadd.f32 1.0, %v303_v53 }
 0x1c1   :  { %v305_v58 = vpop.eup %304 }
 0x1c2   :  { %v204_v59 = vmul.f32 0.5, %v202_v55  ;;  %v203_v60 = vadd.f32 1.0, %v305_v58 }
 0x1c4   :  { %v205_v62 = vmul.f32 0.5, %v203_v60  ;;  %v233_v63 = vsub.f32 %v204_v59, %v229_v54 }
 0x1c6   :  { %v288_v1 = vpack.c.bf16 %v205_v62, %v204_v59  ;;  %v234_v2 = vsub.f32 %v205_v62, %v231_v61  ;;  %v235_v3 = vmul.f32 %v233_v63, %v233_v63 }
 0x1c8   :  { %v236_v5 = vmul.f32 %v234_v2, %v234_v2  ;;  %v217_v6 = vrot.slane %v288_v1, %v216_v0  ;;  %v237_v7 = vsel %vm57_vm1, %v235_v3, 0.0 }
 0x1ca   :  { %v238_v8 = vsel %vm57_vm1, %v236_v5, 0.0  ;;  %v227_v9 = vsel %vm225_vm10, %v217_v6, %v226_v4 }
 0x1cb   :  { %v239_v10 = vadd.f32 %v238_v8, %v237_v7  ;;  %228 = vst [vmem:[#allocation2] sm:$0xf] %v227_v9 }
 0x1cd   :  { %240 = vadd.xlane.f32.xlu0 %v239_v10 }
 0x1ce   :  { %317 = shalt.err (!%p314_p4)
}
 0x1cf   :  { %260 = dma.vmem_to_hbm [thread:$0]  %s258_s3, 64, %s418_s4, [#allocation3]  }
 0x1d0   :  { %s354_s6 = smov [#allocation4]  }
 0x1d1   :  { %s267_s7 = sshll.u32 %s354_s6, 4  ;;  %s268_s7 = int_to_ptr.vmem [resolvable:$true] %s267_s7 }
 0x1d2   :  { %s326_s9 = scalar_lea.vmem %s268_s7, 16  ;;  %s330_s10 = scalar_lea.vmem %s268_s7, 32 }
 0x1d3   :  { %p327_p5 = scmp.ne.s32.totalorder %s268_s7, %s326_s9  ;;  %p331_p6 = scmp.lt.s32.totalorder %s268_s7, %s268_s7 }
 0x1d4   :  { %p332_p7 = scmp.lt.s32.totalorder %s330_s10, %s326_s9 }
 0x1d6   :  { %p333_p8 = por %p332_p7, %p331_p6 }
 0x1d8   :  { %p334_p9 = pnand %p333_p8, %p327_p5 }
 0x256   :  { %v241_v11 = vpop.xlane.xlu0 %240 }
 0x257   :  { %v242_v12 = vrot.slane %v241_v11, 4 }
 0x259   :  { %v243_v13 = vadd.f32 %v242_v12, %v241_v11 }
 0x25b   :  { %v244_v14 = vrot.slane %v243_v13, 2 }
 0x25d   :  { %v245_v15 = vadd.f32 %v244_v14, %v243_v13 }
 0x25f   :  { %v246_v16 = vrot.slane %v245_v15, 1 }
 0x261   :  { %v247_v17 = vadd.f32 %v246_v16, %v245_v15 }
 0x263   :  { %289 = vpush %v247_v17 }
 0x294   :  { %s290_s8 = spop %289 }
 0x295   :  { %v249_v18 = vstv %s290_s8 }
 0x296   :  { %250 = vst [vmem:[#allocation4] sm:$0x1] %v249_v18 }
 0x297   :  { %337 = shalt.err (!%p334_p9)
}
 0x298   :  { %270 = dma.vmem_to_hbm [thread:$0]  %s268_s7, 16, %s419_s5, [#allocation5]  }
 0x299   :  { %346 = dma.done.wait [#allocation3], 64  }
 0x29a   :  { %347 = vsyncadd [#allocation3], 4294967232 }
 0x29b   :  { %348 = dma.done.wait [#allocation5], 16  }
 0x29c   :  { %349 = vsyncadd [#allocation5], 4294967280 }
 0x29d   :  { %277 = vsyncpa [#allocation3], 1 }
 0x29e   :  { %278 = vsyncpa [#allocation5], 1 }

</bundles_post_ra>
